<compile_context>
chip_gen: v5e
topology: v5e:2x2
jax: 0.10.0
libtpu: 0.0.40
codegen_flags: <defaults>
</compile_context>

<pallas_src>
import functools

import jax
import jax.numpy as jnp
from jax.experimental import pallas as pl
from jax.experimental.pallas import tpu as pltpu


def _round_up(n: int, m: int) -> int:
    return ((n + m - 1) // m) * m


# -----------------------------------------------------------------------------
# One-time parameter packing (hoisted OUT of the per-call forward path).
# -----------------------------------------------------------------------------
def pack_params(params):
    """Pack PyTorch-layout params into one aligned (rows, Wc) f32 buffer.

    params: dict with PyTorch nn.Linear layouts:
        w1 (E, L), b1 (E,), w2 (E, E), b2 (E,), w3 (HO, E), b3 (HO,).

    Layout is designed for the lane-dense (batch-on-lanes) kernel: every
    contraction dim is zero-padded to a common width Wc and every segment
    starts on an 8-row (sublane) boundary, so all in-kernel static slices are
    aligned, full-width views.  Call ONCE per parameter set and reuse.

    Returns (packed, meta) with meta = (L, E, HO, Wc, HOp, offsets) — a plain
    hashable tuple of Python ints suitable for jit static_argnames.
    """
    w1, b1 = params["w1"], params["b1"]
    w2, b2 = params["w2"], params["b2"]
    w3, b3 = params["w3"], params["b3"]
    E, L = w1.shape
    HO = w3.shape[0]

    Wc = max(_round_up(L, 8), _round_up(E, 8))   # common padded contraction width
    HOp = _round_up(HO, 8)                       # padded output rows

    o_w1 = 0
    o_w2 = o_w1 + Wc
    o_w3 = o_w2 + Wc
    o_b1 = o_w3 + HOp
    o_b2 = o_b1 + Wc
    o_b3 = o_b2 + Wc
    rows = o_b3 + HOp                            # 4*Wc + 2*HOp, multiple of 8

    packed = jnp.zeros((rows, Wc), jnp.float32)
    packed = packed.at[o_w1:o_w1 + E, :L].set(jnp.asarray(w1, jnp.float32))
    packed = packed.at[o_w2:o_w2 + E, :E].set(jnp.asarray(w2, jnp.float32))
    packed = packed.at[o_w3:o_w3 + HO, :E].set(jnp.asarray(w3, jnp.float32))
    packed = packed.at[o_b1:o_b1 + E, 0].set(jnp.asarray(b1, jnp.float32))
    packed = packed.at[o_b2:o_b2 + E, 0].set(jnp.asarray(b2, jnp.float32))
    packed = packed.at[o_b3:o_b3 + HO, 0].set(jnp.asarray(b3, jnp.float32))
    packed = jax.device_put(packed)

    meta = (L, E, HO, Wc, HOp, (o_w1, o_w2, o_w3, o_b1, o_b2, o_b3))
    return packed, meta


# -----------------------------------------------------------------------------
# Kernel
# -----------------------------------------------------------------------------
def _make_mlp_kernel(Wc, HOp, offs):
    """Fused 3-layer MLP kernel; offsets/sizes are static Python ints."""
    o_w1, o_w2, o_w3, o_b1, o_b2, o_b3 = offs

    def kernel(x_ref, p_ref, out_ref):
        x = x_ref[...]                              # (Wc, TB)  batch on lanes
        w1 = p_ref[o_w1:o_w1 + Wc, :]               # (Wc, Wc)  rows >= E are 0
        w2 = p_ref[o_w2:o_w2 + Wc, :]               # (Wc, Wc)
        w3 = p_ref[o_w3:o_w3 + HOp, :]              # (HOp, Wc) rows >= HO are 0
        b1 = p_ref[o_b1:o_b1 + Wc, 0:1]             # (Wc, 1)
        b2 = p_ref[o_b2:o_b2 + Wc, 0:1]             # (Wc, 1)
        b3 = p_ref[o_b3:o_b3 + HOp, 0:1]            # (HOp, 1)

        # fc1 + ReLU
        h = jnp.dot(w1, x, preferred_element_type=jnp.float32) + b1
        h = jnp.maximum(h, 0.0)
        # fc2 + ReLU
        h = jnp.dot(w2, h, preferred_element_type=jnp.float32) + b2
        h = jnp.maximum(h, 0.0)
        # fc3 (no activation); padded rows stay 0 and are sliced off outside.
        out_ref[...] = jnp.dot(w3, h, preferred_element_type=jnp.float32) + b3

    return kernel


# -----------------------------------------------------------------------------
# Forward
# -----------------------------------------------------------------------------
@functools.partial(jax.jit,
                   static_argnames=("meta", "horizon", "output_size", "block_b"))
def _forward_impl(x, packed, *, meta, horizon, output_size, block_b):
    L, E, HO, Wc, HOp, offs = meta

    # torch's x.float().squeeze(), done safely: only drop the trailing
    # singleton input_size dim; never collapse batch when B == 1.
    x = x.astype(jnp.float32)
    if x.ndim == 3 and x.shape[-1] == 1:
        x2d = x[..., 0]
    elif x.ndim == 2:
        x2d = x
    else:
        raise ValueError(f"unexpected input shape {x.shape}")
    B = x2d.shape[0]

    # Lane-dense layout: batch on the lane (last) axis.  Pad the contraction
    # dim L -> Wc with zeros; single fused pad+transpose outside the kernel.
    xT = jnp.pad(jnp.transpose(x2d), ((0, Wc - L), (0, 0)))

    # Batch (lane) tile selection.
    if B <= 256:
        TB = B                                   # single full-extent block
    else:
        # >= 2 grid steps so dimension_semantics=("parallel",) can shard the
        # batch over v7x's two TensorCores; lane tiles are multiples of 128.
        TB = min(block_b, _round_up(-(-B // 2), 128))
    num_tiles = pl.cdiv(B, TB)

    # Advisory cost so XLA schedules around this tiny custom call.
    flops = 2 * B * (Wc * Wc + Wc * Wc + HOp * Wc)
    bytes_accessed = 4 * (Wc * B + int(packed.shape[0]) * Wc + HOp * B)
    cost = pl.CostEstimate(flops=int(flops), transcendentals=0,
                           bytes_accessed=int(bytes_accessed))

    out_t = pl.pallas_call(
        _make_mlp_kernel(Wc, HOp, offs),
        out_shape=jax.ShapeDtypeStruct((HOp, B), jnp.float32),
        grid=(num_tiles,),
        in_specs=[
            # x^T: tiled along the lane (batch) axis.
            pl.BlockSpec((Wc, TB), lambda i: (0, i)),
            # packed params: constant block index -> stays VMEM-resident.
            pl.BlockSpec(packed.shape, lambda i: (0, 0)),
        ],
        out_specs=pl.BlockSpec((HOp, TB), lambda i: (0, i)),
        compiler_params=pltpu.CompilerParams(
            dimension_semantics=("parallel",)),
        cost_estimate=cost,
    )(xT, packed)

    # Drop padded output rows, undo the transpose, reshape to (B, H, O).
    return jnp.transpose(out_t[:HO, :]).reshape(-1, horizon, output_size)


def auxiliary_forecaster_forward(x, packed, meta, horizon, output_size,
                                 block_b=4096):
    """Pallas implementation of AuxiliaryForecaster.forward.

    Args:
        x: (B, input_length, input_size=1) or (B, input_length).
        packed, meta: result of pack_params(params) — computed once, reused.
        horizon, output_size: forecast shape parameters.
        block_b: max batch (lane) tile for large batches; multiple of 128.

    Returns:
        (out, None) with out of shape (B, horizon, output_size).
    """
    if block_b % 128 != 0:
        raise ValueError("block_b must be a multiple of 128")
    out = _forward_impl(jnp.asarray(x), packed, meta=meta, horizon=horizon,
                        output_size=output_size, block_b=block_b)
    return out, None


# -----------------------------------------------------------------------------
# Synthetic params / pure-JAX reference
# -----------------------------------------------------------------------------
def init_params(key, input_length, embedding_size, horizon, output_size):
    """Deterministic synthetic parameters (PyTorch nn.Linear layout/init)."""
    ks = jax.random.split(key, 6)
    HO = horizon * output_size

    def uniform(k, shape, fan_in):
        bound = 1.0 / (fan_in ** 0.5)
        return jax.random.uniform(k, shape, jnp.float32, -bound, bound)

    return {
        "w1": uniform(ks[0], (embedding_size, input_length), input_length),
        "b1": uniform(ks[1], (embedding_size,), input_length),
        "w2": uniform(ks[2], (embedding_size, embedding_size), embedding_size),
        "b2": uniform(ks[3], (embedding_size,), embedding_size),
        "w3": uniform(ks[4], (HO, embedding_size), embedding_size),
        "b3": uniform(ks[5], (HO,), embedding_size),
    }


def reference_forward(x, params, horizon, output_size):
    """Pure-JAX reference (full f32 precision) for correctness checking."""
    x = jnp.asarray(x, jnp.float32)
    x2d = x[..., 0] if (x.ndim == 3 and x.shape[-1] == 1) else x
    hi = jax.lax.Precision.HIGHEST
    h = jnp.maximum(jnp.dot(x2d, params["w1"].T, precision=hi) + params["b1"], 0.0)
    h = jnp.maximum(jnp.dot(h, params["w2"].T, precision=hi) + params["b2"], 0.0)
    h = jnp.dot(h, params["w3"].T, precision=hi) + params["b3"]
    return h.reshape(-1, horizon, output_size)


if __name__ == "__main__":
    # Small shapes consistent with the module defaults.
    batch = 8
    input_length = 15
    embedding_size = 32
    horizon = 5
    output_size = 1
    input_size = 1

    key = jax.random.PRNGKey(0)
    k_x, k_p, k_big = jax.random.split(key, 3)

    params = init_params(k_p, input_length, embedding_size, horizon, output_size)
    packed, meta = pack_params(params)        # one-time packing, reused below

    x = jax.random.normal(k_x, (batch, input_length, input_size), jnp.float32)
    out, state = auxiliary_forecaster_forward(x, packed, meta, horizon, output_size)
    out = jax.block_until_ready(out)
    assert state is None
    assert out.shape == (batch, horizon, output_size), out.shape
    ref = reference_forward(x, params, horizon, output_size)
    # Tolerance allows for MXU f32 matmul rounding differences.
    assert jnp.allclose(out, ref, atol=2e-3, rtol=2e-3), "mismatch vs reference"

    # torch .squeeze() edge case: batch of 1 must not collapse.
    out1, _ = auxiliary_forecaster_forward(x[:1], packed, meta, horizon, output_size)
    out1 = jax.block_until_ready(out1)
    assert out1.shape == (1, horizon, output_size), out1.shape
    ref1 = reference_forward(x[:1], params, horizon, output_size)
    assert jnp.allclose(out1, ref1, atol=2e-3, rtol=2e-3), "mismatch (B=1)"

    # Larger batch exercises the multi-step, lane-tiled, partial-last-block path.
    big_b = 1000
    xb = jax.random.normal(k_big, (big_b, input_length, input_size), jnp.float32)
    outb, _ = auxiliary_forecaster_forward(xb, packed, meta, horizon, output_size)
    outb = jax.block_until_ready(outb)
    assert outb.shape == (big_b, horizon, output_size), outb.shape
    refb = reference_forward(xb, params, horizon, output_size)
    assert jnp.allclose(outb, refb, atol=2e-3, rtol=2e-3), "mismatch (large B)"

    print("KERNEL_OK")
</pallas_src>

<mosaic_0001>
module attributes {stable_mosaic.version = 11 : i64} {
  func.func @kernel(%arg0: i32, %arg1: memref<32x8xf32, #tpu.memory_space<vmem>>, %arg2: memref<144x32xf32, #tpu.memory_space<vmem>>, %arg3: memref<8x8xf32, #tpu.memory_space<vmem>>) attributes {dimension_semantics = [#tpu.dimension_semantics<parallel>], iteration_bounds = array<i64: 1>, scalar_prefetch = 0 : i64, scratch_operands = 0 : i64, tpu.core_type = #tpu.core_type<tc>, window_params = [{transform_indices = @transform_0, window_bounds = array<i64: 32, 8>}, {pipeline_mode = #tpu.pipeline_mode<synchronous>, transform_indices = @transform_1, window_bounds = array<i64: 144, 32>}, {transform_indices = @transform_2, window_bounds = array<i64: 8, 8>}]} {
    %c0 = arith.constant 0 : index
    %c0_0 = arith.constant 0 : index
    %0 = vector.load %arg1[%c0, %c0_0] : memref<32x8xf32, #tpu.memory_space<vmem>>, vector<32x8xf32>
    %c0_1 = arith.constant 0 : index
    %c0_2 = arith.constant 0 : index
    %1 = vector.load %arg2[%c0_1, %c0_2] : memref<144x32xf32, #tpu.memory_space<vmem>>, vector<32x32xf32>
    %c32 = arith.constant 32 : index
    %c0_3 = arith.constant 0 : index
    %2 = vector.load %arg2[%c32, %c0_3] : memref<144x32xf32, #tpu.memory_space<vmem>>, vector<32x32xf32>
    %c64 = arith.constant 64 : index
    %c0_4 = arith.constant 0 : index
    %3 = vector.load %arg2[%c64, %c0_4] : memref<144x32xf32, #tpu.memory_space<vmem>>, vector<8x32xf32>
    %c72 = arith.constant 72 : index
    %c0_5 = arith.constant 0 : index
    %4 = vector.load %arg2[%c72, %c0_5] : memref<144x32xf32, #tpu.memory_space<vmem>>, vector<32x1xf32>
    %c104 = arith.constant 104 : index
    %c0_6 = arith.constant 0 : index
    %5 = vector.load %arg2[%c104, %c0_6] : memref<144x32xf32, #tpu.memory_space<vmem>>, vector<32x1xf32>
    %c136 = arith.constant 136 : index
    %c0_7 = arith.constant 0 : index
    %6 = vector.load %arg2[%c136, %c0_7] : memref<144x32xf32, #tpu.memory_space<vmem>>, vector<8x1xf32>
    %cst = arith.constant dense<0.000000e+00> : vector<32x8xf32>
    %7 = tpu.matmul %1, %0, %cst {dimension_numbers = #tpu.dot_dimension_numbers<[1], [0], [0], [1], [0, 0, 1, 1], [], []>} : vector<32x32xf32>, vector<32x8xf32>, vector<32x8xf32> -> vector<32x8xf32>
    %8 = vector.broadcast %4 : vector<32x1xf32> to vector<32x8xf32>
    %9 = arith.addf %7, %8 : vector<32x8xf32>
    %cst_8 = arith.constant 0.000000e+00 : f32
    %10 = vector.broadcast %cst_8 : f32 to vector<32x8xf32>
    %11 = arith.maximumf %9, %10 : vector<32x8xf32>
    %cst_9 = arith.constant dense<0.000000e+00> : vector<32x8xf32>
    %12 = tpu.matmul %2, %11, %cst_9 {dimension_numbers = #tpu.dot_dimension_numbers<[1], [0], [0], [1], [0, 0, 1, 1], [], []>} : vector<32x32xf32>, vector<32x8xf32>, vector<32x8xf32> -> vector<32x8xf32>
    %13 = vector.broadcast %5 : vector<32x1xf32> to vector<32x8xf32>
    %14 = arith.addf %12, %13 : vector<32x8xf32>
    %cst_10 = arith.constant 0.000000e+00 : f32
    %15 = vector.broadcast %cst_10 : f32 to vector<32x8xf32>
    %16 = arith.maximumf %14, %15 : vector<32x8xf32>
    %cst_11 = arith.constant dense<0.000000e+00> : vector<8x8xf32>
    %17 = tpu.matmul %3, %16, %cst_11 {dimension_numbers = #tpu.dot_dimension_numbers<[1], [0], [0], [1], [0, 0, 1, 1], [], []>} : vector<8x32xf32>, vector<32x8xf32>, vector<8x8xf32> -> vector<8x8xf32>
    %18 = vector.broadcast %6 : vector<8x1xf32> to vector<8x8xf32>
    %19 = arith.addf %17, %18 : vector<8x8xf32>
    %c0_12 = arith.constant 0 : index
    %c0_13 = arith.constant 0 : index
    %20 = vector.load %arg3[%c0_12, %c0_13] : memref<8x8xf32, #tpu.memory_space<vmem>>, vector<8x8xf32>
    tpu.vector_store %arg3[%c0_12, %c0_13], %19 {strides = array<i32>} : memref<8x8xf32, #tpu.memory_space<vmem>>, vector<8x8xf32>,
    return
  }
  func.func @transform_0(%arg0: i32) -> (i32, i32) {
    %c0_i32 = arith.constant 0 : i32
    %c0_i32_0 = arith.constant 0 : i32
    return %c0_i32, %arg0 : i32, i32
  }
  func.func @transform_1(%arg0: i32) -> (i32, i32) {
    %c0_i32 = arith.constant 0 : i32
    %c0_i32_0 = arith.constant 0 : i32
    %c0_i32_1 = arith.constant 0 : i32
    return %c0_i32, %c0_i32_0 : i32, i32
  }
  func.func @transform_2(%arg0: i32) -> (i32, i32) {
    %c0_i32 = arith.constant 0 : i32
    %c0_i32_0 = arith.constant 0 : i32
    return %c0_i32, %arg0 : i32, i32
  }
}

</mosaic_0001>

<bundles_post_ra>
// kernel: _forward_impl.1
= control target key start
LH: loop header
LB: loop body
LE: loop exit
PB: predicated region body
PF: predicated region fallthrough
CT: control target
= control target key end

     0   :  { %v219_v2 = vmov 0   ;;  %vm53_vm0 = vcmask 261120   ;;  %vm192_vm1 = vcmask 64512   ;;  %s313_s0 = inlined_call_operand.vmem [shape: f32[32,8], index: 0, kind: input, shape index: {}]   ;;  %s314_s1 = inlined_call_operand.vmem [shape: f32[144,32], index: 1, kind: input, shape index: {}]   ;;  %s315_s2 = inlined_call_operand.vmem [shape: f32[8,8], index: 2, kind: output, shape index: {}]  }
   0x1   :  { %v14_v0 = vld [vmem:[%s313_s0 + $0x18] sm:$0xff]  ;;  %v13_v1 = vld [vmem:[%s313_s0 + $0x10] sm:$0xff]  ;;  %216 = vset.pattern.permute.xlu0 %v219_v2  ;;  %217 = vset.pattern.permute.xlu1 %v219_v2  ;;  %v12_v3 = vld [vmem:[%s313_s0 + $0x8] sm:$0xff] }
   0x2   :  { %207 = vmatpush.msra.mxu3 %v14_v0  ;;  %78 = vmatpush.msra.mxu0 %v14_v0  ;;  %v27_v4 = vld [vmem:[%s314_s1 + $0x60] sm:$0xff]  ;;  %v25_v5 = vld [vmem:[%s314_s1 + $0x50] sm:$0xff]  ;;  %v16_v7 = vld [vmem:[%s314_s1 + $0x8] sm:$0xff] }
   0x3   :  { %218 = vset.pattern.permute.xlu2 %v219_v2  ;;  %50 = vperm.xlu0 %216, %v27_v4   ;;  %v11_v6 = vld [vmem:[%s313_s0] sm:$0xff]  ;;  %v26_v9 = vld [vmem:[%s314_s1 + $0x58] sm:$0xff]  ;;  %v24_v10 = vld [vmem:[%s314_s1 + $0x48] sm:$0xff] }
   0x4   :  { %208 = vmatpush.msra.mxu3 %v13_v1  ;;  %40 = vperm.xlu1 %217, %v25_v5   ;;  %v15_v8 = vld [vmem:[%s314_s1] sm:$0xff]  ;;  %v17_v11 = vld [vmem:[%s314_s1 + $0x10] sm:$0xff]  ;;  %v28_v13 = vld [vmem:[%s314_s1 + $0x68] sm:$0xff] }
   0x5   :  { %79 = vmatpush.msra.mxu0 %v13_v1  ;;  %v29_v12 = vld [vmem:[%s314_s1 + $0x70] sm:$0xff]  ;;  %v18_v14 = vld [vmem:[%s314_s1 + $0x18] sm:$0xff]  ;;  %v31_v19 = vld [vmem:[%s314_s1 + $0x80] sm:$0xff] }
   0x6   :  { %209 = vmatpush.msra.mxu3 %v12_v3  ;;  %116 = vperm.xlu2 %218, %v31_v19   ;;  %v30_v27 = vld [vmem:[%s314_s1 + $0x78] sm:$0xff]  ;;  %v19_v33 = vld [vmem:[%s314_s1 + $0x20] sm:$0xff]  ;;  %v20_v34 = vld [vmem:[%s314_s1 + $0x28] sm:$0xff] }
   0x7   :  { %80 = vmatpush.msra.mxu0 %v12_v3  ;;  %v32_v35 = vld [vmem:[%s314_s1 + $0x88] sm:$0xff]  ;;  %v21_v36 = vld [vmem:[%s314_s1 + $0x30] sm:$0xff]  ;;  %v22_v37 = vld [vmem:[%s314_s1 + $0x38] sm:$0xff] }
   0x8   :  { %210 = vmatpush.msra.mxu3 %v11_v6  ;;  %v23_v54 = vld [vmem:[%s314_s1 + $0x40] sm:$0xff] }
   0x9   :  { %199 = vmatmul.msk.f32.vlgmr.msra.gmra.mxu3 %vm53_vm0, %v16_v7  ;;  %81 = vmatpush.msra.mxu0 %v11_v6 }
   0xa   :  { %198 = vmatmul.msk.f32.vlgmr.msra.gmra.mxu0 %vm53_vm0, %v15_v8 }
   0xb   :  { %45 = vperm.xlu0 %216, %v26_v9  }
   0xc   :  { %35 = vperm.xlu1 %217, %v24_v10  }
   0xe   :  { %111 = vperm.xlu2 %218, %v30_v27  }
  0x11   :  { %200 = vmatmul.msk.f32.gmra.mxu3 %vm53_vm0, %v17_v11 }
  0x13   :  { %106 = vperm.xlu0 %216, %v29_v12  }
  0x14   :  { %101 = vperm.xlu1 %217, %v28_v13  }
  0x16   :  { %166 = vperm.xlu2 %218, %v32_v35  }
  0x19   :  { %201 = vmatmul.msk.f32.gmra.mxu3 %vm53_vm0, %v18_v14 }
  0x60   :  { %v117_v39 = vpop.permute.xlu2 %116 }
  0x68   :  { %v112_v41 = vpop.permute.xlu2 %111 }
  0x70   :  { %v167_v55 = vpop.permute.xlu2 %166 }
  0x75   :  { %v51_v16 = vpop.permute.xlu0 %50 }
  0x76   :  { %v41_v18 = vpop.permute.xlu1 %40 }
  0x7d   :  { %v46_v20 = vpop.permute.xlu0 %45 }
  0x7e   :  { %v36_v28 = vpop.permute.xlu1 %35 }
  0x85   :  { %v107_v45 = vpop.permute.xlu0 %106 }
  0x86   :  { %v102_v49 = vpop.permute.xlu1 %101 }
  0x87   :  { %v83_v24 = vpop.f32.mrf.mxu0 }
  0x88   :  { %v84_v30 = vadd.f32 %v83_v24, %v36_v28 }
  0x8a   :  { %v95_v32 = vmax.f32 %v84_v30, 0.0 }
  0x8c   :  { %v86_v15 = vpop.f32.mrf.mxu3 }
  0x8d   :  { %v87_v25 = vadd.f32 %v86_v15, %v41_v18 }
  0x8f   :  { %v96_v31 = vmax.f32 %v87_v25, 0.0 }
  0x94   :  { %v89_v17 = vpop.f32.mrf.mxu3 }
  0x95   :  { %v90_v22 = vadd.f32 %v89_v17, %v46_v20 }
  0x97   :  { %v97_v29 = vmax.f32 %v90_v22, 0.0 }
  0x9c   :  { %v92_v21 = vpop.f32.mrf.mxu3 }
  0x9d   :  { %v93_v23 = vadd.f32 %v92_v21, %v51_v16 }
  0x9f   :  { %v98_v26 = vmax.f32 %v93_v23, 0.0 }
  0xa1   :  { %143 = vmatpush.msrb.mxu0 %v98_v26  ;;  %211 = vmatpush.msra.mxu1 %v98_v26 }
  0xa3   :  { %144 = vmatpush.msrb.mxu0 %v97_v29  ;;  %212 = vmatpush.msra.mxu1 %v97_v29 }
  0xa5   :  { %145 = vmatpush.msrb.mxu0 %v96_v31  ;;  %213 = vmatpush.msra.mxu1 %v96_v31 }
  0xa7   :  { %146 = vmatpush.msrb.mxu0 %v95_v32  ;;  %214 = vmatpush.msra.mxu1 %v95_v32 }
  0xa8   :  { %202 = vmatmul.msk.f32.vlgmr.msrb.gmra.mxu0 %vm53_vm0, %v19_v33  ;;  %203 = vmatmul.msk.f32.vlgmr.msra.gmra.mxu1 %vm53_vm0, %v20_v34 }
  0xb0   :  { %204 = vmatmul.msk.f32.gmra.mxu1 %vm53_vm0, %v21_v36 }
  0xb8   :  { %205 = vmatmul.msk.f32.gmra.mxu1 %vm53_vm0, %v22_v37 }
 0x125   :  { %v151_v38 = vpop.f32.mrf.mxu1  ;;  %v148_v46 = vpop.f32.mrf.mxu0 }
 0x126   :  { %v152_v47 = vadd.f32 %v151_v38, %v107_v45  ;;  %v149_v50 = vadd.f32 %v148_v46, %v102_v49 }
 0x128   :  { %v161_v52 = vmax.f32 %v152_v47, 0.0  ;;  %v160_v53 = vmax.f32 %v149_v50, 0.0 }
 0x12d   :  { %v154_v40 = vpop.f32.mrf.mxu1 }
 0x12e   :  { %v155_v43 = vadd.f32 %v154_v40, %v112_v41 }
 0x130   :  { %v162_v51 = vmax.f32 %v155_v43, 0.0 }
 0x135   :  { %v157_v42 = vpop.f32.mrf.mxu1 }
 0x136   :  { %v158_v44 = vadd.f32 %v157_v42, %v117_v39 }
 0x138   :  { %v163_v48 = vmax.f32 %v158_v44, 0.0 }
 0x13a   :  { %184 = vmatpush.msra.mxu2 %v163_v48 }
 0x13c   :  { %185 = vmatpush.msra.mxu2 %v162_v51 }
 0x13e   :  { %186 = vmatpush.msra.mxu2 %v161_v52 }
 0x140   :  { %187 = vmatpush.msra.mxu2 %v160_v53 }
 0x141   :  { %206 = vmatmul.msk.f32.vlgmr.msra.gmra.mxu2 %vm53_vm0, %v23_v54 }
 0x1c4   :  { %v189_v56 = vpop.f32.mrf.mxu2 }
 0x1c5   :  { %v190_v57 = vadd.f32 %v189_v56, %v167_v55 }
 0x1c7   :  { %193 = vst.msk [vmem:[%s315_s2] sm:$0xff] %vm192_vm1, %v190_v57 }

</bundles_post_ra>
